<compile_context>
chip_gen: v5e
topology: v5e:2x2
jax: 0.10.0
libtpu: 0.0.40
codegen_flags: <defaults>
</compile_context>

<pallas_src>
import jax
import jax.numpy as jnp
from jax.experimental import pallas as pl
from jax.experimental.pallas import tpu as pltpu


def fs_kernel(v_ref, u_ref, w_ref, b_ref, z_ref):
    # v_ref: (1, cv, T)     -- channels on sublanes, spatial on lanes
    # u_ref: (1, cu, T)
    # w_ref: (2*cu, cv)     -- stacked folded conv+BN weights [W1; W2]
    # b_ref: (2*cu, 1)      -- stacked folded conv+BN biases  [b1; b2]
    # z_ref: (1, cu, T)
    cu = u_ref.shape[1]
    v = v_ref[0].astype(jnp.float32)                      # (cv, T)
    u = u_ref[0].astype(jnp.float32)                      # (cu, T)

    # Both 1x1 convs (+ folded BN) in a single MXU matmul, then ReLU.
    xk = jnp.dot(w_ref[...], v, preferred_element_type=jnp.float32) + b_ref[...]
    xk = jnp.maximum(xk, 0.0)                             # (2*cu, T)
    x = xk[:cu, :]                                        # relu(W1 @ v + b1)
    k = xk[cu:, :]                                        # relu(W2 @ v + b2)

    # z = k / (1 + exp(-x*u)) == k * sigmoid(x*u) == k * (0.5*tanh(0.5*r)+0.5)
    r = x * u
    z = k * (0.5 * jnp.tanh(0.5 * r) + 0.5)
    z_ref[0] = z.astype(z_ref.dtype)


def _device_defaults():
    """(spatial tile cap in lanes, vmem_limit_bytes) per generation.

    128 MiB-VMEM chips (v5e/v6e): big tiles amortize the ~0.35us/step grid
    overhead.  Smaller/unknown VMEM (v7x: 64 MiB per TC): stay conservative.
    """
    cap, vmem = 32768, 48 << 20
    try:
        info = pltpu.get_tpu_info()
        vmem_cap = getattr(info, "vmem_capacity_bytes", None)
        if vmem_cap is not None and vmem_cap >= (100 << 20):
            cap, vmem = 65536, 96 << 20
    except Exception:
        pass  # conservative defaults work on every generation
    return cap, vmem


def _choose_tile(hw, n, cap):
    """Pick (tile_sp, hw_padded): lane tile is a multiple of 128, <= cap,
    divides the (possibly padded) spatial extent, and the total grid has at
    least 2 steps so both v7x TensorCores get work."""
    cap = max(128, (cap // 128) * 128)
    hw_pad = ((hw + 127) // 128) * 128

    if hw_pad <= cap:
        tile = hw_pad
    else:
        tile = None
        t = cap
        while t >= 128:
            if hw_pad % t == 0:
                tile = t
                break
            t -= 128
        if tile is None:                      # no nice divisor: tile at cap, pad
            tile = cap
            hw_pad = ((hw_pad + tile - 1) // tile) * tile

    # Guarantee >= 2 grid steps (v7x has 2 TCs; one extra step is ~0.35us).
    if n * (hw_pad // tile) < 2 and tile >= 256:
        tile = ((tile // 2 + 127) // 128) * 128
        hw_pad = ((hw_pad + tile - 1) // tile) * tile
    return tile, hw_pad


def fs_module_pallas(v_nchw, u_nchw, w1, b1, w2, b2, *,
                     tile_sp=None, io_dtype=None, out_dtype=None,
                     vmem_limit_bytes=None):
    """FSModule forward.

    v_nchw: (N, cv, H, W); u_nchw: (N, cu, H, W)
    w1, w2: (cu, cv) folded conv+BN weights; b1, b2: (cu,) folded biases.
    io_dtype: optional narrower dtype (e.g. jnp.bfloat16) for the streaming
      v/u inputs -- recommended on all generations incl. v5e (compute is
      up-cast to f32 in-kernel).  Note the inputs are rounded to io_dtype, so
      results differ from the f32 reference at that precision.
    out_dtype: output dtype; defaults to io_dtype (or f32 if io_dtype is None)
      -- z is the single largest HBM stream, so narrowing it is the biggest
      bandwidth win.
    """
    N, cv, H, W = v_nchw.shape
    cu = u_nchw.shape[1]
    HW = H * W

    cap_default, vmem_default = _device_defaults()
    if vmem_limit_bytes is None:
        vmem_limit_bytes = vmem_default

    if tile_sp is None:
        tile_sp, HW_pad = _choose_tile(HW, N, cap_default)
    else:
        assert tile_sp % 128 == 0, "tile_sp must be a multiple of 128"
        HW_pad = ((HW + tile_sp - 1) // tile_sp) * tile_sp

    if out_dtype is None:
        out_dtype = io_dtype if io_dtype is not None else jnp.float32

    # NCHW kept as-is: fold (H, W) -> H*W so spatial is the lane axis and
    # channels the sublane axis.  Pure reshape, no transposes.
    v3 = v_nchw.reshape(N, cv, HW)
    u3 = u_nchw.reshape(N, cu, HW)
    if HW_pad != HW:
        pad = HW_pad - HW
        v3 = jnp.pad(v3, ((0, 0), (0, 0), (0, pad)))
        u3 = jnp.pad(u3, ((0, 0), (0, 0), (0, pad)))
    if io_dtype is not None:
        v3 = v3.astype(io_dtype)
        u3 = u3.astype(io_dtype)

    # Fuse the two 1x1 convs: one (2*cu, cv) matmul per tile.
    w = jnp.concatenate([w1, w2], axis=0).astype(jnp.float32)         # (2*cu, cv)
    b = jnp.concatenate([b1, b2], axis=0).reshape(2 * cu, 1).astype(jnp.float32)

    grid = (N, HW_pad // tile_sp)
    z3 = pl.pallas_call(
        fs_kernel,
        out_shape=jax.ShapeDtypeStruct((N, cu, HW_pad), out_dtype),
        grid_spec=pltpu.PrefetchScalarGridSpec(
            num_scalar_prefetch=0,
            grid=grid,
            in_specs=[
                pl.BlockSpec((1, cv, tile_sp), lambda n, s: (n, 0, s)),
                pl.BlockSpec((1, cu, tile_sp), lambda n, s: (n, 0, s)),
                pl.BlockSpec((2 * cu, cv), lambda n, s: (0, 0)),
                pl.BlockSpec((2 * cu, 1), lambda n, s: (0, 0)),
            ],
            out_specs=pl.BlockSpec((1, cu, tile_sp), lambda n, s: (n, 0, s)),
        ),
        compiler_params=pltpu.CompilerParams(
            dimension_semantics=("parallel", "parallel"),
            vmem_limit_bytes=vmem_limit_bytes,
        ),
    )(v3, u3, w, b)

    if HW_pad != HW:
        z3 = z3[:, :, :HW]
    # (N, cu, H*W) -> NCHW (pure reshape, no data movement)
    return z3.reshape(N, cu, H, W)


def fold_conv_bn(w_conv, b_conv, gamma, beta, mean, var, eps=1e-5):
    """Fold eval-mode BatchNorm into a 1x1 conv. w_conv: (cu, cv)."""
    scale = gamma / jnp.sqrt(var + eps)              # (cu,)
    w = w_conv * scale[:, None]                      # (cu, cv)
    b = (b_conv - mean) * scale + beta               # (cu,)
    return w, b


def fs_module_ref(v_nchw, u_nchw, w1, b1, w2, b2):
    """Plain-JAX reference (NCHW), for checking."""
    x = jnp.einsum('oc,nchw->nohw', w1, v_nchw) + b1[None, :, None, None]
    x = jnp.maximum(x, 0.0)
    k = jnp.einsum('oc,nchw->nohw', w2, v_nchw) + b2[None, :, None, None]
    k = jnp.maximum(k, 0.0)
    r = x * u_nchw
    return k / (1.0 + jnp.exp(-r))


if __name__ == "__main__":
    key = jax.random.PRNGKey(0)
    keys = jax.random.split(key, 12)

    N, cv, cu, H, W = 2, 4, 8, 16, 16

    # Inputs
    v = jax.random.normal(keys[0], (N, cv, H, W), dtype=jnp.float32)
    u = jax.random.normal(keys[1], (N, cu, H, W), dtype=jnp.float32)

    # Deterministic synthetic parameters.  1x1 conv weights stored as (cu, cv)
    # (PyTorch's (cu, cv, 1, 1) with the trailing 1x1 squeezed).
    w1_conv = jax.random.normal(keys[2], (cu, cv), dtype=jnp.float32) * 0.5
    b1_conv = jax.random.normal(keys[3], (cu,), dtype=jnp.float32) * 0.1
    w2_conv = jax.random.normal(keys[4], (cu, cv), dtype=jnp.float32) * 0.5
    b2_conv = jax.random.normal(keys[5], (cu,), dtype=jnp.float32) * 0.1

    # BatchNorm params (eval-mode / running stats).
    gamma1 = 1.0 + 0.1 * jax.random.normal(keys[6], (cu,), dtype=jnp.float32)
    beta1 = 0.1 * jax.random.normal(keys[7], (cu,), dtype=jnp.float32)
    mean1 = 0.1 * jax.random.normal(keys[8], (cu,), dtype=jnp.float32)
    var1 = jnp.abs(1.0 + 0.1 * jax.random.normal(keys[9], (cu,), dtype=jnp.float32))
    gamma2 = 1.0 + 0.1 * jax.random.normal(keys[10], (cu,), dtype=jnp.float32)
    beta2 = 0.1 * jax.random.normal(keys[11], (cu,), dtype=jnp.float32)
    mean2 = jnp.zeros((cu,), dtype=jnp.float32)
    var2 = jnp.ones((cu,), dtype=jnp.float32)

    # TODO(synk): BatchNorm is implemented in inference mode (folded into the
    # conv); training-mode batch statistics are not computed in the kernel.
    w1, b1 = fold_conv_bn(w1_conv, b1_conv, gamma1, beta1, mean1, var1)
    w2, b2 = fold_conv_bn(w2_conv, b2_conv, gamma2, beta2, mean2, var2)

    # f32 I/O path (exact-parity mode; sigmoid via exact tanh identity).
    z = fs_module_pallas(v, u, w1, b1, w2, b2)
    z = jax.block_until_ready(z)
    z_ref = fs_module_ref(v, u, w1, b1, w2, b2)
    assert z.shape == (N, cu, H, W)
    assert z.dtype == jnp.float32
    assert jnp.allclose(z, z_ref, rtol=1e-4, atol=1e-4), \
        float(jnp.max(jnp.abs(z - z_ref)))

    # bf16 streaming-I/O + bf16 output path (halves HBM traffic on every
    # generation; in-kernel math stays f32 so it is also safe on v5e).
    # Inputs are rounded to bf16, so compare against a pre-quantized reference.
    z_bf = fs_module_pallas(v, u, w1, b1, w2, b2, io_dtype=jnp.bfloat16)
    z_bf = jax.block_until_ready(z_bf)
    assert z_bf.dtype == jnp.bfloat16
    vq = v.astype(jnp.bfloat16).astype(jnp.float32)
    uq = u.astype(jnp.bfloat16).astype(jnp.float32)
    z_ref_bf = fs_module_ref(vq, uq, w1, b1, w2, b2)
    assert jnp.allclose(z_bf.astype(jnp.float32), z_ref_bf, rtol=2e-2, atol=2e-2)

    print("KERNEL_OK")
</pallas_src>

<mosaic_0001>
module attributes {stable_mosaic.version = 11 : i64} {
  func.func @fs_kernel(%arg0: i32, %arg1: i32, %arg2: memref<1x4x256xf32, #tpu.memory_space<vmem>>, %arg3: memref<1x8x256xf32, #tpu.memory_space<vmem>>, %arg4: memref<16x4xf32, #tpu.memory_space<vmem>>, %arg5: memref<16x1xf32, #tpu.memory_space<vmem>>, %arg6: memref<1x8x256xf32, #tpu.memory_space<vmem>>) attributes {dimension_semantics = [#tpu.dimension_semantics<parallel>, #tpu.dimension_semantics<parallel>], iteration_bounds = array<i64: 2, 1>, scalar_prefetch = 0 : i64, scratch_operands = 0 : i64, tpu.core_type = #tpu.core_type<tc>, window_params = [{transform_indices = @transform_0, window_bounds = array<i64: 1, 4, 256>}, {transform_indices = @transform_1, window_bounds = array<i64: 1, 8, 256>}, {pipeline_mode = #tpu.pipeline_mode<synchronous>, transform_indices = @transform_2, window_bounds = array<i64: 16, 4>}, {pipeline_mode = #tpu.pipeline_mode<synchronous>, transform_indices = @transform_3, window_bounds = array<i64: 16, 1>}, {transform_indices = @transform_4, window_bounds = array<i64: 1, 8, 256>}]} {
    %c0 = arith.constant 0 : index
    %c0_0 = arith.constant 0 : index
    %c0_1 = arith.constant 0 : index
    %0 = vector.load %arg2[%c0, %c0_0, %c0_1] : memref<1x4x256xf32, #tpu.memory_space<vmem>>, vector<1x4x256xf32>
    %1 = vector.shape_cast %0 : vector<1x4x256xf32> to vector<4x256xf32>
    %c0_2 = arith.constant 0 : index
    %c0_3 = arith.constant 0 : index
    %c0_4 = arith.constant 0 : index
    %2 = vector.load %arg3[%c0_2, %c0_3, %c0_4] : memref<1x8x256xf32, #tpu.memory_space<vmem>>, vector<1x8x256xf32>
    %3 = vector.shape_cast %2 : vector<1x8x256xf32> to vector<8x256xf32>
    %c0_5 = arith.constant 0 : index
    %c0_6 = arith.constant 0 : index
    %4 = vector.load %arg4[%c0_5, %c0_6] : memref<16x4xf32, #tpu.memory_space<vmem>>, vector<16x4xf32>
    %cst = arith.constant dense<0.000000e+00> : vector<16x256xf32>
    %5 = tpu.matmul %4, %1, %cst {dimension_numbers = #tpu.dot_dimension_numbers<[1], [0], [0], [1], [0, 0, 1, 1], [], []>} : vector<16x4xf32>, vector<4x256xf32>, vector<16x256xf32> -> vector<16x256xf32>
    %c0_7 = arith.constant 0 : index
    %c0_8 = arith.constant 0 : index
    %6 = vector.load %arg5[%c0_7, %c0_8] : memref<16x1xf32, #tpu.memory_space<vmem>>, vector<16x1xf32>
    %7 = vector.broadcast %6 : vector<16x1xf32> to vector<16x256xf32>
    %8 = arith.addf %5, %7 : vector<16x256xf32>
    %cst_9 = arith.constant 0.000000e+00 : f32
    %9 = vector.broadcast %cst_9 : f32 to vector<16x256xf32>
    %10 = arith.maximumf %8, %9 : vector<16x256xf32>
    %11 = vector.extract_strided_slice %10 {offsets = [0, 0], sizes = [8, 256], strides = [1, 1]} : vector<16x256xf32> to vector<8x256xf32>
    %12 = vector.extract_strided_slice %10 {offsets = [8, 0], sizes = [8, 256], strides = [1, 1]} : vector<16x256xf32> to vector<8x256xf32>
    %13 = arith.mulf %11, %3 : vector<8x256xf32>
    %cst_10 = arith.constant 5.000000e-01 : f32
    %14 = vector.broadcast %cst_10 : f32 to vector<8x256xf32>
    %15 = arith.mulf %14, %13 : vector<8x256xf32>
    %16 = math.tanh %15 : vector<8x256xf32>
    %cst_11 = arith.constant 5.000000e-01 : f32
    %17 = vector.broadcast %cst_11 : f32 to vector<8x256xf32>
    %18 = arith.mulf %17, %16 : vector<8x256xf32>
    %cst_12 = arith.constant 5.000000e-01 : f32
    %19 = vector.broadcast %cst_12 : f32 to vector<8x256xf32>
    %20 = arith.addf %18, %19 : vector<8x256xf32>
    %21 = arith.mulf %12, %20 : vector<8x256xf32>
    %c0_13 = arith.constant 0 : index
    %c0_14 = arith.constant 0 : index
    %c0_15 = arith.constant 0 : index
    %22 = vector.load %arg6[%c0_13, %c0_14, %c0_15] : memref<1x8x256xf32, #tpu.memory_space<vmem>>, vector<1x8x256xf32>
    %23 = vector.shape_cast %22 : vector<1x8x256xf32> to vector<8x256xf32>
    %24 = vector.shape_cast %21 : vector<8x256xf32> to vector<1x8x256xf32>
    tpu.vector_store %arg6[%c0_13, %c0_14, %c0_15], %24 {strides = array<i32>} : memref<1x8x256xf32, #tpu.memory_space<vmem>>, vector<1x8x256xf32>,
    return
  }
  func.func @transform_0(%arg0: i32, %arg1: i32) -> (i32, i32, i32) {
    %c0_i32 = arith.constant 0 : i32
    %c0_i32_0 = arith.constant 0 : i32
    return %arg0, %c0_i32, %arg1 : i32, i32, i32
  }
  func.func @transform_1(%arg0: i32, %arg1: i32) -> (i32, i32, i32) {
    %c0_i32 = arith.constant 0 : i32
    %c0_i32_0 = arith.constant 0 : i32
    return %arg0, %c0_i32, %arg1 : i32, i32, i32
  }
  func.func @transform_2(%arg0: i32, %arg1: i32) -> (i32, i32) {
    %c0_i32 = arith.constant 0 : i32
    %c0_i32_0 = arith.constant 0 : i32
    %c0_i32_1 = arith.constant 0 : i32
    return %c0_i32, %c0_i32_0 : i32, i32
  }
  func.func @transform_3(%arg0: i32, %arg1: i32) -> (i32, i32) {
    %c0_i32 = arith.constant 0 : i32
    %c0_i32_0 = arith.constant 0 : i32
    %c0_i32_1 = arith.constant 0 : i32
    return %c0_i32, %c0_i32_0 : i32, i32
  }
  func.func @transform_4(%arg0: i32, %arg1: i32) -> (i32, i32, i32) {
    %c0_i32 = arith.constant 0 : i32
    %c0_i32_0 = arith.constant 0 : i32
    return %arg0, %c0_i32, %arg1 : i32, i32, i32
  }
}

</mosaic_0001>

<bundles_post_ra>
// kernel: tpu_custom_call.1
= control target key start
LH: loop header
LB: loop body
LE: loop exit
PB: predicated region body
PF: predicated region fallthrough
CT: control target
= control target key end

     0   :  { %9 = vsyncpa [#allocation3], 0  ;;  %s864_s0 = inlined_call_operand.hbm [shape: f32[2,4,256], index: 0, kind: input, shape index: {}]   ;;  %s865_s1 = inlined_call_operand.vmem [shape: f32[2,8,256], index: 1, kind: input, shape index: {}]   ;;  %s866_s2 = inlined_call_operand.vmem [shape: f32[16,4], index: 2, kind: input, shape index: {}]   ;;  %s867_s3 = inlined_call_operand.vmem [shape: f32[16,1], index: 3, kind: input, shape index: {}]   ;;  %s868_s4 = inlined_call_operand.hbm [shape: f32[2,8,256], index: 4, kind: output, shape index: {}]  }
   0x1   :  { %11 = vsyncpa [#allocation3 + $0x1], 0 }
   0x2   :  { %12 = vsyncpa [#allocation4], 0 }
   0x3   :  { %14 = vsyncpa [#allocation4 + $0x1], 0  ;;  %s726_s15 = smov 0   ;;  %s728_s16 = smov 0  }
   0x4   :  { %s730_s17 = smov 0   ;;  %s732_s18 = smov 0  }
   0x5   :  { %s734_s19 = smov 0   ;;  %s736_s20 = smov 0  }
   0x6 LB: > { %s490_s21 = sadd.s32 4294967295, %s698_s20   ;;  %s491_s22 = sadd.s32 4294967294, %s698_s20   ;;  %s698_s20 = sphi %s736_s20, %s20_s20   ;;  %s694_s19 = sphi %s734_s19, %s877_s19   ;;  %s690_s18 = sphi %s732_s18, %s876_s18   ;;  %s686_s17 = sphi %s730_s17, %s875_s17   ;;  %s682_s16 = sphi %s728_s16, %s874_s16   ;;  %s678_s15 = sphi %s726_s15, %s873_s15  }
   0x7   : > { %s32_s23 = sadd.s32 1, %s694_s19  ;;  %s41_s24 = sadd.s32 1, %s686_s17 }
   0x8   : > { %p34_p0 = scmp.ge.s32.totalorder %s32_s23, 2  ;;  %p48_p1 = scmp.ne.s32.totalorder %s686_s17, %s682_s16 }
   0x9   : > { %p49_p2 = scmp.eq.s32.totalorder %s698_s20, 0  ;;  %p54_p3 = scmp.ne.s32.totalorder %s682_s16, %s678_s15 }
   0xa   : > { %s879_s23 = smov (%p34_p0, %s32_s23), 0  ;;  %p55_p5 = scmp.eq.s32.totalorder %s490_s21, 0 }
   0xb   : > { %p767_p4 = por %p49_p2, %p48_p1  ;;  %s36_s26 = ssub.s32 %s694_s19, %s879_s23 }
   0xc   : > { %p150_p6 = scmp.eq.s32.totalorder %s490_s21, 1  ;;  %p39_p7 = scmp.eq.s32.totalorder %s36_s26, 0 }
   0xd   : > { %p773_p8 = por %p55_p5, %p54_p3  ;;  %p156_p10 = scmp.eq.s32.totalorder %s491_s22, 1 }
   0xe   : > { %p777_p9 = por %p150_p6, %p48_p1  ;;  %p493_p12 = scmp.ge.s32.totalorder %s698_s20, 2 }
   0xf   : > { %s782_s29 = scalar_select %p39_p7, %s686_s17, %s41_s24  }
  0x10   : > { %p784_p11 = por %p156_p10, %p54_p3  ;;  %p530_p13 = scmp.lt.s32.totalorder %s698_s20, 2 }
  0x11   : > { %s182_s5 = sand.u32 1, %s686_s17   ;;  %s513_s7 = sshll.u32 %s694_s19, 3 }
  0x12   : > { %s494_s6 = sshll.u32 %s182_s5, 3  ;;  %s193_s10 = scalar_lea.hbm %s864_s0, %s513_s7 }
  0x13   : > { %s186_s11 = scalar_lea.vmem [#allocation2], %s494_s6  ;;  %s195_s13 = sshll.u32 %s193_s10, 4  ;;  %s196_s13 = int_to_ptr.hbm [resolvable:$true] %s195_s13 }
  0x14   : > { %s197_s12 = sshll.u32 %s186_s11, 4  ;;  %p523_p0 = pnand %p530_p13, %p767_p4  ;;  %s198_s12 = int_to_ptr.vmem [resolvable:$true] %s197_s12 }
  0x15   : > { %p497_p1 = scmp.ge.s32.totalorder %s698_s20, 1  ;;  %p215_p2 = scmp.lt.s32.totalorder %s698_s20, 3 }
  0x16   : > { %s183_s14 = scalar_lea.sflag [#allocation3], %s182_s5 }
  0x17   : > { %525 = dma.hbm_to_vmem [thread:$0]  (!%p523_p0), %s196_s13, 128, %s198_s12, %s183_s14  }
  0x18   : > { %p216_p3 = pnand %p497_p1, %p215_p2 }
  0x19   : > { %s800_s21 = sand.u32 (!%p216_p3), 1, %s682_s16  }
  0x1a   : > { %219 = sbr.rel (%p216_p3) target bundleno = 194 (0xc2), region = 36  ;;  %s498_s22 = sshll.u32 (!%p216_p3), %s800_s21, 3 }
  0x1b   : > { %s222_s24 = scalar_lea.sflag (!%p216_p3), [#allocation3], %s800_s21  ;;  %s225_s26 = scalar_lea.vmem (!%p216_p3), [#allocation2], %s498_s22 }
  0x1f   : > { %669 = dma.done.wait (%p773_p8), %s222_s24, 128  }
  0x20   : > { %671 = vsyncadd (%p773_p8), %s222_s24, 4294967168  ;;  %v700_v0 = vmov 0   ;;  %v272_v1 = vld [vmem:[%s225_s26] sm:$0xff]  ;;  %v277_v2 = vld [vmem:[%s867_s3] sm:$0xff]  ;;  %vm300_vm0 = vcmask 1043456   ;;  %vm293_vm1 = vcmask 31744  }
  0x21   : > { %581 = vset.pattern.permute.xlu0 %v700_v0  ;;  %290 = vst [vmem:[#allocation1] ss:$2 sm:$0xff] %v272_v1  ;;  %v275_v3 = vld [vmem:[%s866_s2] sm:$0xff]  ;;  %v276_v4 = vld [vmem:[%s866_s2 + $0x8] sm:$0xff]  ;;  %p262_p4 = scmp.lt.s32.totalorder %s690_s18, 1  ;;  %s499_s24 = sshll.u32 %s800_s21, 4 }
  0x22   : > { %281 = vperm.xlu0 %581, %v277_v2   ;;  %v278_v7 = vld [vmem:[%s867_s3 + $0x8] sm:$0xff]  ;;  %s515_s26 = sshll.u32 %s690_s18, 4  ;;  %s259_s7 = scalar_lea.vmem [#allocation5], %s499_s24 }
  0x23   : > { %s263_s11 = scalar_select %p262_p4, %s690_s18, 1 }
  0x24   : > { %s383_s6 = scalar_lea.hbm %s868_s4, %s515_s26  ;;  %s385_s8 = sshll.u32 %s259_s7, 4  ;;  %s386_s8 = int_to_ptr.vmem [resolvable:$true] %s385_s8 }
  0x25   : > { %s514_s12 = sshll.u32 %s263_s11, 4  ;;  %s387_s27 = sshll.u32 %s383_s6, 4  ;;  %s388_s27 = int_to_ptr.hbm [resolvable:$true] %s387_s27 }
  0x26   : > { %s269_s22 = scalar_lea.vmem %s865_s1, %s514_s12  ;;  %s370_s18 = scalar_lea.sflag [#allocation4], %s800_s21 }
  0x27   : > { %v273_v12 = vld [vmem:[%s269_s22] sm:$0xff]  ;;  %v274_v15 = vld [vmem:[%s269_s22 + $0x8] sm:$0xff]  ;;  %s630_s9 = sshra.s32 %s388_s27, 4  ;;  %s636_s13 = scalar_lea.hbm %s868_s4, 32  ;;  %s631_s9 = int_to_ptr.hbm [resolvable:$true] %s630_s9 }
  0x28   : > { %v291_v5 = vld.sshfl [vmem:[#allocation1] sm:$0xff pattern:$0x75316420]  ;;  %v292_v6 = vld.sshfl [vmem:[#allocation1 + $0x8] sm:$0xff pattern:$0x75316420]  ;;  %p637_p8 = scmp.lt.s32.totalorder %s631_s9, %s868_s4 }
  0x29   : > { %502 = vmatpush.msk.msra.mxu0 %vm300_vm0, %v291_v5  ;;  %516 = vmatpush.msk.msra.mxu2 %vm300_vm0, %v291_v5  ;;  %s632_s10 = scalar_lea.hbm %s631_s9, 16 }
  0x2a   : > { %505 = vmatpush.msk.msra.mxu1 %vm300_vm0, %v292_v6  ;;  %517 = vmatpush.msk.msra.mxu3 %vm300_vm0, %v292_v6  ;;  %p633_p5 = scmp.ne.s32.totalorder %s631_s9, %s632_s10  ;;  %p638_p10 = scmp.lt.s32.totalorder %s636_s13, %s632_s10 }
  0x2b   : > { %503 = vmatmul.msk.f32.vlgmr.msra.gmra.mxu0 %vm293_vm1, %v275_v3  ;;  %504 = vmatmul.msk.f32.vlgmr.msra.gmra.mxu2 %vm293_vm1, %v276_v4 }
  0x2c   : > { %506 = vmatmul.msk.f32.vlgmr.msra.gmra.mxu1 %vm293_vm1, %v275_v3  ;;  %507 = vmatmul.msk.f32.vlgmr.msra.gmra.mxu3 %vm293_vm1, %v276_v4  ;;  %p634_p6 = pnand %p633_p5, %p777_p9  ;;  %p639_p13 = por %p638_p10, %p637_p8 }
  0x2d   : > { %286 = vperm.xlu0 %581, %v278_v7  }
  0x2e   : > { %p635_p7 = pneg %p634_p6 }
  0x30   : > { %p640_p0 = pnand %p639_p13, %p635_p7 }
  0x94   : > { %v282_v8 = vpop.permute.xlu0 %281 }
  0x9f   : > { %v287_v23 = vpop.permute.xlu0 %286 }
  0xa8   : > { %v322_v9 = vpop.f32.mrf.mxu0 }
  0xa9   : > { %v323_v10 = vadd.f32 %v322_v9, %v282_v8  ;;  %v345_v11 = vpop.f32.mrf.mxu1 }
  0xaa   : > { %v346_v13 = vadd.f32 %v345_v11, %v282_v8 }
  0xab   : > { %v351_v14 = vmax.f32 %v323_v10, 0.0 }
  0xac   : > { %v352_v16 = vmax.f32 %v346_v13, 0.0 }
  0xad   : > { %v355_v17 = vmul.f32 %v351_v14, %v273_v12 }
  0xae   : > { %v356_v18 = vmul.f32 %v352_v16, %v274_v15  ;;  %v325_v21 = vpop.f32.mrf.mxu2 }
  0xaf   : > { %v357_v19 = vmul.f32 0.5, %v355_v17  ;;  %v348_v22 = vpop.f32.mrf.mxu3  ;;  %v326_v24 = vadd.f32 %v325_v21, %v287_v23 }
  0xb0   : > { %v358_v20 = vmul.f32 0.5, %v356_v18  ;;  %v349_v26 = vadd.f32 %v348_v22, %v287_v23 }
  0xb1   : > { %582 = vtanh.f32 %v357_v19  ;;  %v353_v30 = vmax.f32 %v326_v24, 0.0 }
  0xb2   : > { %584 = vtanh.f32 %v358_v20  ;;  %v354_v32 = vmax.f32 %v349_v26, 0.0 }
  0xb7   : > { %v583_v25 = vpop.eup %582 }
  0xb8   : > { %v585_v27 = vpop.eup %584  ;;  %v361_v28 = vmul.f32 0.5, %v583_v25 }
  0xb9   : > { %v362_v29 = vmul.f32 0.5, %v585_v27 }
  0xba   : > { %v363_v31 = vadd.f32 0.5, %v361_v28 }
  0xbb   : > { %v364_v33 = vadd.f32 0.5, %v362_v29 }
  0xbc   : > { %v365_v34 = vmul.f32 %v363_v31, %v353_v30 }
  0xbd   : > { %v366_v35 = vmul.f32 %v364_v33, %v354_v32 }
  0xbe   : > { %367 = vst [vmem:[%s259_s7] sm:$0xff] %v365_v34 }
  0xbf   : > { %368 = vst [vmem:[%s259_s7 + $0x8] sm:$0xff] %v366_v35 }
  0xc0   : > { %643 = shalt.err (!%p640_p0)
}
  0xc1   : > { %520 = dma.vmem_to_hbm [thread:$0]  (%p777_p9), %s386_s8, 256, %s388_s27, %s370_s18  }
  0xc2 PF: > { %s399_s21 = sand.u32 1, %s678_s15   ;;  %p527_p1 = pnand %p493_p12, %p784_p11 }
  0xc3   : > { %s400_s24 = scalar_lea.sflag [#allocation4], %s399_s21 }
  0xc4   : > { %p528_p2 = pneg %p527_p1 }
  0xc6   : > { %673 = dma.done.wait (%p528_p2), %s400_s24, 256  }
  0xc7   : > { %675 = vsyncadd (%p528_p2), %s400_s24, 4294967040  ;;  %s20_s20 = sadd.s32 1, %s698_s20   ;;  %s873_s15 = smov %s682_s16 }
  0xc8   : > { %p17_p3 = scmp.ge.s32.totalorder %s20_s20, 4   ;;  %s874_s16 = smov %s686_s17 }
  0xc9   : > { %s875_s17 = smov %s782_s29  ;;  %s876_s18 = smov %s694_s19 }
  0xca   : > { %s877_s19 = smov %s879_s23  ;;  %19 = sbr.rel (!%p17_p3) target bundleno = 6 (0x6), region = 84 }
  0xcf   :  { %406 = vsyncpa [#allocation3], 1 }
  0xd0   :  { %408 = vsyncpa [#allocation3 + $0x1], 1 }
  0xd1   :  { %409 = vsyncpa [#allocation4], 1 }
  0xd2   :  { %411 = vsyncpa [#allocation4 + $0x1], 1 }

</bundles_post_ra>
